<compile_context>
chip_gen: v5e
topology: v5e:2x2
jax: 0.10.0
libtpu: 0.0.40
codegen_flags: <defaults>
</compile_context>

<pallas_src>
import functools

import jax
import jax.numpy as jnp
from jax.experimental import pallas as pl
from jax.experimental.pallas import tpu as pltpu

SLANES = 128            # stats lane width (lane 0 = loss sum, 1 = correct sum, 2 = count)
MAX_TILE_POINTS = 32768  # points per grid step (large -> amortizes per-step overhead)


def _round_up(x, m):
    return ((x + m - 1) // m) * m


def _default_num_slices():
    """1 TensorCore slice on v5e/v6e, 2 on v7x (2 TCs per chip)."""
    try:
        kind = jax.devices()[0].device_kind.lower()
    except Exception:
        return 1
    return 2 if "v7" in kind else 1


def seg_loss_kernel(logits_ref, meta_ref, out_ref, *, n_points):
    """Per tile: per-point CE loss + correctness, reduced into per-batch-id sums.

    logits_ref : (C, TN)   f32   classes on sublanes, points on lanes
    meta_ref   : (1, TN)   int32 packed (batch_id << 16) | class_id
    out_ref    : (BPAD, SLANES) f32 accumulator (resident across the inner grid axis)
    """
    s = pl.program_id(0)
    j = pl.program_id(1)

    @pl.when(j == 0)
    def _():
        out_ref[...] = jnp.zeros_like(out_ref)

    logits = logits_ref[...]                       # (C, TN) f32
    packed = meta_ref[...]                         # (1, TN) int32
    bid = packed >> 16                             # (1, TN)  batch id (>= 0)
    tgt = packed & 0xFFFF                          # (1, TN)  class id

    c, tn = logits.shape
    bpad, slanes = out_ref.shape

    # --- ragged-tail mask: only points with global index < n_points count ---
    off = (s * pl.num_programs(1) + j) * tn
    pt_iota = jax.lax.broadcasted_iota(jnp.int32, (1, tn), 1)
    in_range = (pt_iota + off) < n_points                                   # (1, TN)

    class_iota = jax.lax.broadcasted_iota(jnp.int32, (c, tn), 0)

    # --- cross entropy: lse(logits) - logits[target]  (per point, on lanes) ---
    m = jnp.max(logits, axis=0, keepdims=True)                              # (1, TN)
    lse = m + jnp.log(jnp.sum(jnp.exp(logits - m), axis=0, keepdims=True))  # (1, TN)
    tgt_logit = jnp.sum(jnp.where(class_iota == tgt, logits, 0.0),
                        axis=0, keepdims=True)                              # (1, TN)
    loss = lse - tgt_logit                                                  # (1, TN)

    # --- accuracy: first index attaining the max (== argmax w/ first-index ties) ---
    first_max = jnp.min(jnp.where(logits >= m,
                                  class_iota.astype(jnp.float32),
                                  float(c)),
                        axis=0, keepdims=True)                              # (1, TN)
    correct = (first_max == tgt.astype(jnp.float32)).astype(jnp.float32)    # (1, TN)

    # --- segmented (per-batch-id) sums; out-of-range lanes excluded by mask ---
    b_iota = jax.lax.broadcasted_iota(jnp.int32, (bpad, tn), 0)
    member = (b_iota == bid) & in_range                                     # (BPAD, TN)

    loss_b = jnp.sum(jnp.where(member, loss, 0.0), axis=1, keepdims=True)   # (BPAD, 1)
    corr_b = jnp.sum(jnp.where(member, correct, 0.0), axis=1, keepdims=True)
    cnt_b = jnp.sum(member.astype(jnp.float32), axis=1, keepdims=True)

    lane = jax.lax.broadcasted_iota(jnp.int32, (bpad, slanes), 1)
    contrib = (jnp.where(lane == 0, loss_b, 0.0)
               + jnp.where(lane == 1, corr_b, 0.0)
               + jnp.where(lane == 2, cnt_b, 0.0))                          # (BPAD, SLANES)
    out_ref[...] += contrib


@functools.partial(jax.jit,
                   static_argnames=("num_classes", "max_batches",
                                    "tile_points", "num_slices"))
def segmentation_loss(segmentation, label, num_classes,
                      max_batches=8, tile_points=MAX_TILE_POINTS,
                      num_slices=None):
    """JAX/Pallas equivalent of SegmentationLoss.forward (single-GPU list, no weight).

    segmentation : (N, C) float32 logits
    label        : (N, D) float,  label[:, -2] = batch id, label[:, -1] = class id
    max_batches  : static upper bound on the number of distinct batch ids
                   (ids must lie in [0, max_batches); larger ids are silently
                   dropped -- keep this bound >= the true number of events).
    returns      : {'accuracy': scalar, 'loss': scalar}
    """
    n, c = segmentation.shape
    assert c == num_classes, "num_classes must match segmentation.shape[-1]"
    if num_slices is None:
        num_slices = _default_num_slices()
    num_slices = max(int(num_slices), 1)
    bpad = _round_up(max(int(max_batches), 1), 8)

    # Large, lane-aligned point tile (bounded so double-buffered inputs stay
    # far under every generation's scoped-VMEM default).
    tn = min(int(tile_points), _round_up(n, 128))
    tn = max(_round_up(tn, 128), 128)
    total_blocks = pl.cdiv(n, tn)
    tiles_per_slice = pl.cdiv(total_blocks, num_slices)
    last_block = total_blocks - 1

    # Classes on sublanes, points on lanes. No padding: the cdiv grid plus the
    # in-kernel tail mask handle the ragged last block.
    logits_t = jnp.transpose(segmentation.astype(jnp.float32))          # (C, N)

    # NOTE: float -> int truncation mirrors the original .long() cast; label
    # columns are expected to hold exact integral values.
    bid = label[:, -2].astype(jnp.int32)
    tgt = label[:, -1].astype(jnp.int32)
    meta = ((bid << 16) | (tgt & 0xFFFF)).reshape(1, n)                  # (1, N) i32

    if num_slices * tiles_per_slice == total_blocks:
        def pt_index_map(s, j):
            return (0, s * tiles_per_slice + j)
    else:
        # Overflow (s, j) combinations re-read the last block; their global
        # point offset is >= n so the kernel masks them to zero contribution.
        def pt_index_map(s, j):
            return (0, jnp.minimum(s * tiles_per_slice + j, last_block))

    kernel = functools.partial(seg_loss_kernel, n_points=n)
    out = pl.pallas_call(
        kernel,
        out_shape=jax.ShapeDtypeStruct((num_slices * bpad, SLANES), jnp.float32),
        grid_spec=pltpu.PrefetchScalarGridSpec(
            num_scalar_prefetch=0,
            grid=(num_slices, tiles_per_slice),
            in_specs=[
                pl.BlockSpec((c, tn), pt_index_map),
                pl.BlockSpec((1, tn), pt_index_map),
            ],
            out_specs=pl.BlockSpec((bpad, SLANES), lambda s, j: (s, 0)),
        ),
        compiler_params=pltpu.CompilerParams(
            dimension_semantics=("parallel", "arbitrary")),
    )(logits_t, meta)

    # Sum the per-slice partial accumulators, then do the tiny per-event math.
    stats = out.reshape(num_slices, bpad, SLANES).sum(axis=0)            # (bpad, SLANES)
    loss_sum = stats[:, 0]        # per-batch-id sum of CE losses
    correct_sum = stats[:, 1]     # per-batch-id count of correct predictions
    count = stats[:, 2]           # per-batch-id number of points

    present = (count > 0).astype(jnp.float32)
    safe_count = jnp.maximum(count, 1.0)
    per_batch_loss = loss_sum / safe_count
    per_batch_acc = correct_sum / safe_count
    n_events = jnp.maximum(jnp.sum(present), 1.0)

    total_loss = jnp.sum(per_batch_loss * present) / n_events
    total_acc = jnp.sum(per_batch_acc * present) / n_events
    return {"accuracy": total_acc, "loss": total_loss}


def _reference(segmentation, label):
    """Pure-JAX reference mirroring the PyTorch loop, for a sanity check."""
    import numpy as np
    bids = label[:, -2].astype(jnp.int32)
    tgts = label[:, -1].astype(jnp.int32)
    logits = segmentation.astype(jnp.float32)
    lse = jax.scipy.special.logsumexp(logits, axis=-1)
    ce = lse - jnp.take_along_axis(logits, tgts[:, None], axis=-1)[:, 0]
    correct = (jnp.argmax(logits, axis=-1) == tgts).astype(jnp.float32)
    total_loss, total_acc, count = 0.0, 0.0, 0
    for b in np.unique(np.asarray(bids)):
        mask = bids == int(b)
        nb = jnp.sum(mask)
        total_loss += jnp.sum(jnp.where(mask, ce, 0.0)) / nb
        total_acc += jnp.sum(jnp.where(mask, correct, 0.0)) / nb
        count += 1
    return {"accuracy": total_acc / count, "loss": total_loss / count}


if __name__ == "__main__":
    key = jax.random.PRNGKey(0)
    k1, k2, k3 = jax.random.split(key, 3)

    N, C, B = 256, 5, 2          # points, classes, events in the minibatch
    logits = jax.random.normal(k1, (N, C), dtype=jnp.float32)
    coords = jax.random.uniform(k2, (N, 3), dtype=jnp.float32) * 16.0
    batch_ids = jnp.concatenate(
        [jnp.zeros((N // 2,), jnp.float32), jnp.ones((N - N // 2,), jnp.float32)])
    classes = jax.random.randint(k3, (N,), 0, C).astype(jnp.float32)
    # label: (N, dim + batch_id + 1) = (N, 5); col -2 = batch id, col -1 = class
    label = jnp.concatenate(
        [coords, batch_ids[:, None], classes[:, None]], axis=-1)

    out = segmentation_loss(logits, label, num_classes=C)
    out = jax.tree_util.tree_map(jax.block_until_ready, out)

    ref = _reference(logits, label)
    assert abs(float(out["loss"]) - float(ref["loss"])) < 1e-4, (out, ref)
    assert abs(float(out["accuracy"]) - float(ref["accuracy"])) < 1e-5, (out, ref)

    print("KERNEL_OK")
</pallas_src>

<mosaic_0001>
module attributes {stable_mosaic.version = 11 : i64} {
  func.func @seg_loss_kernel(%arg0: i32, %arg1: i32, %arg2: memref<5x256xf32, #tpu.memory_space<vmem>>, %arg3: memref<1x256xi32, #tpu.memory_space<vmem>>, %arg4: memref<8x128xf32, #tpu.memory_space<vmem>>) attributes {dimension_semantics = [#tpu.dimension_semantics<parallel>, #tpu.dimension_semantics<arbitrary>], iteration_bounds = array<i64: 1, 1>, scalar_prefetch = 0 : i64, scratch_operands = 0 : i64, tpu.core_type = #tpu.core_type<tc>, window_params = [{transform_indices = @transform_0, window_bounds = array<i64: 5, 256>}, {transform_indices = @transform_1, window_bounds = array<i64: 1, 256>}, {transform_indices = @transform_2, window_bounds = array<i64: 8, 128>}]} {
    %c0_i32 = arith.constant 0 : i32
    %0 = arith.cmpi eq, %arg1, %c0_i32 : i32
    %1 = arith.extui %0 : i1 to i32
    %c0_i32_0 = arith.constant 0 : i32
    %2 = arith.cmpi ne, %1, %c0_i32_0 : i32
    scf.if %2 {
      %cst_24 = arith.constant 0.000000e+00 : f32
      %90 = vector.broadcast %cst_24 : f32 to vector<8x128xf32>
      %c0_25 = arith.constant 0 : index
      %c0_26 = arith.constant 0 : index
      %91 = vector.load %arg4[%c0_25, %c0_26] : memref<8x128xf32, #tpu.memory_space<vmem>>, vector<8x128xf32>
      tpu.vector_store %arg4[%c0_25, %c0_26], %90 {strides = array<i32>} : memref<8x128xf32, #tpu.memory_space<vmem>>, vector<8x128xf32>,
    } else {
    }
    %c0 = arith.constant 0 : index
    %c0_1 = arith.constant 0 : index
    %3 = vector.load %arg2[%c0, %c0_1] : memref<5x256xf32, #tpu.memory_space<vmem>>, vector<5x256xf32>
    %c0_2 = arith.constant 0 : index
    %c0_3 = arith.constant 0 : index
    %4 = vector.load %arg3[%c0_2, %c0_3] : memref<1x256xi32, #tpu.memory_space<vmem>>, vector<1x256xi32>
    %c16_i32 = arith.constant 16 : i32
    %5 = vector.broadcast %c16_i32 : i32 to vector<1x256xi32>
    %6 = arith.shrsi %4, %5 : vector<1x256xi32>
    %c65535_i32 = arith.constant 65535 : i32
    %7 = vector.broadcast %c65535_i32 : i32 to vector<1x256xi32>
    %8 = arith.andi %4, %7 : vector<1x256xi32>
    %c1_i32 = arith.constant 1 : i32
    %9 = arith.muli %arg0, %c1_i32 : i32
    %10 = arith.addi %9, %arg1 : i32
    %c256_i32 = arith.constant 256 : i32
    %11 = arith.muli %10, %c256_i32 : i32
    %12 = tpu.iota {dimensions = array<i32: 1>} : vector<1x256xi32>
    %13 = vector.broadcast %11 : i32 to vector<1x256xi32>
    %14 = arith.addi %12, %13 : vector<1x256xi32>
    %c256_i32_4 = arith.constant 256 : i32
    %15 = vector.broadcast %c256_i32_4 : i32 to vector<1x256xi32>
    %16 = arith.cmpi slt, %14, %15 : vector<1x256xi32>
    %17 = tpu.iota {dimensions = array<i32: 0>} : vector<5x256xi32>
    %cst = arith.constant dense<0xFF800000> : vector<256xf32>
    %18 = vector.multi_reduction <maximumf>, %3, %cst [0] : vector<5x256xf32> to vector<256xf32>
    %19 = vector.shape_cast %18 : vector<256xf32> to vector<1x256xf32>
    %20 = vector.broadcast %19 : vector<1x256xf32> to vector<5x256xf32>
    %21 = arith.subf %3, %20 : vector<5x256xf32>
    %22 = math.exp %21 : vector<5x256xf32>
    %cst_5 = arith.constant dense<0.000000e+00> : vector<256xf32>
    %23 = vector.multi_reduction <add>, %22, %cst_5 [0] : vector<5x256xf32> to vector<256xf32>
    %24 = vector.shape_cast %23 : vector<256xf32> to vector<1x256xf32>
    %25 = math.log %24 : vector<1x256xf32>
    %26 = arith.addf %19, %25 : vector<1x256xf32>
    %27 = vector.broadcast %8 : vector<1x256xi32> to vector<5x256xi32>
    %28 = arith.cmpi eq, %17, %27 : vector<5x256xi32>
    %cst_6 = arith.constant 0.000000e+00 : f32
    %29 = vector.broadcast %cst_6 : f32 to vector<5x256xf32>
    %30 = arith.select %28, %3, %29 : vector<5x256xi1>, vector<5x256xf32>
    %cst_7 = arith.constant dense<0.000000e+00> : vector<256xf32>
    %31 = vector.multi_reduction <add>, %30, %cst_7 [0] : vector<5x256xf32> to vector<256xf32>
    %32 = vector.shape_cast %31 : vector<256xf32> to vector<1x256xf32>
    %33 = arith.subf %26, %32 : vector<1x256xf32>
    %34 = vector.broadcast %19 : vector<1x256xf32> to vector<5x256xf32>
    %35 = arith.cmpf oge, %3, %34 : vector<5x256xf32>
    %36 = arith.sitofp %17 : vector<5x256xi32> to vector<5x256xf32>
    %cst_8 = arith.constant 5.000000e+00 : f32
    %37 = vector.broadcast %cst_8 : f32 to vector<5x256xf32>
    %38 = arith.select %35, %36, %37 : vector<5x256xi1>, vector<5x256xf32>
    %cst_9 = arith.constant dense<0x7F800000> : vector<256xf32>
    %39 = vector.multi_reduction <minimumf>, %38, %cst_9 [0] : vector<5x256xf32> to vector<256xf32>
    %40 = vector.shape_cast %39 : vector<256xf32> to vector<1x256xf32>
    %41 = arith.sitofp %8 : vector<1x256xi32> to vector<1x256xf32>
    %42 = arith.cmpf oeq, %40, %41 : vector<1x256xf32>
    %43 = arith.extui %42 : vector<1x256xi1> to vector<1x256xi32>
    %44 = arith.sitofp %43 : vector<1x256xi32> to vector<1x256xf32>
    %45 = tpu.iota {dimensions = array<i32: 0>} : vector<8x256xi32>
    %46 = vector.broadcast %6 : vector<1x256xi32> to vector<8x256xi32>
    %47 = arith.cmpi eq, %45, %46 : vector<8x256xi32>
    %48 = vector.broadcast %16 : vector<1x256xi1> to vector<8x256xi1>
    %49 = arith.andi %47, %48 : vector<8x256xi1>
    %cst_10 = arith.constant 0.000000e+00 : f32
    %50 = vector.shape_cast %33 : vector<1x256xf32> to vector<1x256xf32>
    %51 = vector.broadcast %50 : vector<1x256xf32> to vector<8x256xf32>
    %52 = vector.broadcast %cst_10 : f32 to vector<8x256xf32>
    %53 = arith.select %49, %51, %52 : vector<8x256xi1>, vector<8x256xf32>
    %cst_11 = arith.constant dense<0.000000e+00> : vector<8xf32>
    %54 = vector.multi_reduction <add>, %53, %cst_11 [1] : vector<8x256xf32> to vector<8xf32>
    %55 = vector.shape_cast %54 : vector<8xf32> to vector<8x1xf32>
    %cst_12 = arith.constant 0.000000e+00 : f32
    %56 = vector.shape_cast %44 : vector<1x256xf32> to vector<1x256xf32>
    %57 = vector.broadcast %56 : vector<1x256xf32> to vector<8x256xf32>
    %58 = vector.broadcast %cst_12 : f32 to vector<8x256xf32>
    %59 = arith.select %49, %57, %58 : vector<8x256xi1>, vector<8x256xf32>
    %cst_13 = arith.constant dense<0.000000e+00> : vector<8xf32>
    %60 = vector.multi_reduction <add>, %59, %cst_13 [1] : vector<8x256xf32> to vector<8xf32>
    %61 = vector.shape_cast %60 : vector<8xf32> to vector<8x1xf32>
    %62 = arith.extui %49 : vector<8x256xi1> to vector<8x256xi32>
    %63 = arith.sitofp %62 : vector<8x256xi32> to vector<8x256xf32>
    %cst_14 = arith.constant dense<0.000000e+00> : vector<8xf32>
    %64 = vector.multi_reduction <add>, %63, %cst_14 [1] : vector<8x256xf32> to vector<8xf32>
    %65 = vector.shape_cast %64 : vector<8xf32> to vector<8x1xf32>
    %66 = tpu.iota {dimensions = array<i32: 1>} : vector<8x128xi32>
    %c0_i32_15 = arith.constant 0 : i32
    %67 = vector.broadcast %c0_i32_15 : i32 to vector<8x128xi32>
    %68 = arith.cmpi eq, %66, %67 : vector<8x128xi32>
    %cst_16 = arith.constant 0.000000e+00 : f32
    %69 = vector.shape_cast %55 : vector<8x1xf32> to vector<8x1xf32>
    %70 = vector.broadcast %69 : vector<8x1xf32> to vector<8x128xf32>
    %71 = vector.broadcast %cst_16 : f32 to vector<8x128xf32>
    %72 = arith.select %68, %70, %71 : vector<8x128xi1>, vector<8x128xf32>
    %c1_i32_17 = arith.constant 1 : i32
    %73 = vector.broadcast %c1_i32_17 : i32 to vector<8x128xi32>
    %74 = arith.cmpi eq, %66, %73 : vector<8x128xi32>
    %cst_18 = arith.constant 0.000000e+00 : f32
    %75 = vector.shape_cast %61 : vector<8x1xf32> to vector<8x1xf32>
    %76 = vector.broadcast %75 : vector<8x1xf32> to vector<8x128xf32>
    %77 = vector.broadcast %cst_18 : f32 to vector<8x128xf32>
    %78 = arith.select %74, %76, %77 : vector<8x128xi1>, vector<8x128xf32>
    %79 = arith.addf %72, %78 : vector<8x128xf32>
    %c2_i32 = arith.constant 2 : i32
    %80 = vector.broadcast %c2_i32 : i32 to vector<8x128xi32>
    %81 = arith.cmpi eq, %66, %80 : vector<8x128xi32>
    %cst_19 = arith.constant 0.000000e+00 : f32
    %82 = vector.shape_cast %65 : vector<8x1xf32> to vector<8x1xf32>
    %83 = vector.broadcast %82 : vector<8x1xf32> to vector<8x128xf32>
    %84 = vector.broadcast %cst_19 : f32 to vector<8x128xf32>
    %85 = arith.select %81, %83, %84 : vector<8x128xi1>, vector<8x128xf32>
    %86 = arith.addf %79, %85 : vector<8x128xf32>
    %c0_20 = arith.constant 0 : index
    %c0_21 = arith.constant 0 : index
    %87 = vector.load %arg4[%c0_20, %c0_21] : memref<8x128xf32, #tpu.memory_space<vmem>>, vector<8x128xf32>
    %88 = arith.addf %87, %86 : vector<8x128xf32>
    %c0_22 = arith.constant 0 : index
    %c0_23 = arith.constant 0 : index
    %89 = vector.load %arg4[%c0_22, %c0_23] : memref<8x128xf32, #tpu.memory_space<vmem>>, vector<8x128xf32>
    tpu.vector_store %arg4[%c0_22, %c0_23], %88 {strides = array<i32>} : memref<8x128xf32, #tpu.memory_space<vmem>>, vector<8x128xf32>,
    return
  }
  func.func @transform_0(%arg0: i32, %arg1: i32) -> (i32, i32) {
    %c1_i32 = arith.constant 1 : i32
    %0 = arith.muli %arg0, %c1_i32 : i32
    %1 = arith.addi %0, %arg1 : i32
    %c0_i32 = arith.constant 0 : i32
    %c0_i32_0 = arith.constant 0 : i32
    return %c0_i32, %1 : i32, i32
  }
  func.func @transform_1(%arg0: i32, %arg1: i32) -> (i32, i32) {
    %c1_i32 = arith.constant 1 : i32
    %0 = arith.muli %arg0, %c1_i32 : i32
    %1 = arith.addi %0, %arg1 : i32
    %c0_i32 = arith.constant 0 : i32
    %c0_i32_0 = arith.constant 0 : i32
    return %c0_i32, %1 : i32, i32
  }
  func.func @transform_2(%arg0: i32, %arg1: i32) -> (i32, i32) {
    %c0_i32 = arith.constant 0 : i32
    %c0_i32_0 = arith.constant 0 : i32
    return %arg0, %c0_i32 : i32, i32
  }
}

</mosaic_0001>

<bundles_post_ra>
// kernel: segmentation_loss.1
= control target key start
LH: loop header
LB: loop body
LE: loop exit
PB: predicated region body
PF: predicated region fallthrough
CT: control target
= control target key end

     0   :  { %7 = vsyncpa [#allocation3], 0  ;;  %s254_s12 = smov [#allocation2]   ;;  %s348_s0 = inlined_call_operand.hbm [shape: f32[5,256], index: 0, kind: input, shape index: {}]   ;;  %s349_s1 = inlined_call_operand.vmem [shape: s32[1,256], index: 1, kind: input, shape index: {}]   ;;  %s350_s2 = inlined_call_operand.vmem [shape: f32[8,128], index: 2, kind: output, shape index: {}]  }
   0x1   :  { %s17_s11 = sshll.u32 %s348_s0, 4  ;;  %s19_s13 = sshll.u32 %s254_s12, 4  ;;  %s18_s11 = int_to_ptr.hbm [resolvable:$true] %s17_s11  ;;  %s20_s13 = int_to_ptr.vmem [resolvable:$true] %s19_s13 }
   0x2   :  { %22 = dma.hbm_to_vmem [thread:$0]  %s18_s11, 256, %s20_s13, [#allocation3]  }
   0x3   :  { %252 = dma.done.wait [#allocation3], 256  }
   0x4   :  { %253 = vsyncadd [#allocation3], 4294967040  ;;  %vm72_vm0 = vcmask 1044480   ;;  %v55_v0 = vld [vmem:[#allocation2] sm:$0x1f]  ;;  %v62_v12 = vlaneseq  ;;  %v255_v59 = vmov 0.0  }
   0x5   :  { %v56_v1 = vld [vmem:[#allocation2 + $0x8] sm:$0x1f]  ;;  %v73_v2 = vsel %vm72_vm0, %v55_v0, -inf  ;;  %v57_v6 = vld [vmem:[%s349_s1] sm:$0x3] }
   0x6   :  { %v80_v3 = vsel %vm72_vm0, %v56_v1, -inf  ;;  %v74_v4 = vrot.slane %v73_v2, 4  ;;  %v279_v11 = vand.u32 65535, %v57_v6  ;;  %v282_v17 = vshrl.u32 %v62_v12, 7 }
   0x7   :  { %v81_v5 = vrot.slane %v80_v3, 4  ;;  %v58_v35 = vshra.s32 %v57_v6, 16 }
   0x8   :  { %v75_v7 = vmax.f32 %v73_v2, %v74_v4  ;;  %v113_v18 = vperm.slane %v279_v11, 0  ;;  %v114_v19 = vperm.slane %v279_v11, 1  ;;  %v137_v22 = vcvt.s32.f32 %v282_v17 }
   0x9   :  { %v82_v8 = vmax.f32 %v80_v3, %v81_v5  ;;  %v314_v45 = vperm.slane %v58_v35, 0  ;;  %v316_v46 = vperm.slane %v58_v35, 1 }
   0xa   :  { %v76_v9 = vrot.slane %v75_v7, 2  ;;  %vm294_vm1 = vcmp.eq.s32.totalorder %v282_v17, %v113_v18  ;;  %vm299_vm2 = vcmp.eq.s32.totalorder %v282_v17, %v114_v19 }
   0xb   :  { %v83_v10 = vrot.slane %v82_v8, 2  ;;  %v117_v31 = vsel %vm294_vm1, %v55_v0, 0.0  ;;  %v118_v32 = vsel %vm299_vm2, %v56_v1, 0.0  ;;  %vm168_vm5 = vcmp.eq.s32.totalorder %v282_v17, %v314_v45 }
   0xc   :  { %v77_v13 = vmax.f32 %v75_v7, %v76_v9  ;;  %v119_v36 = vsel %vm72_vm0, %v117_v31, 0.0  ;;  %v126_v37 = vsel %vm72_vm0, %v118_v32, 0.0  ;;  %vm169_vm6 = vcmp.eq.s32.totalorder %v282_v17, %v316_v46 }
   0xd   :  { %v84_v14 = vmax.f32 %v82_v8, %v83_v10  ;;  %v120_v41 = vrot.slane %v119_v36, 4  ;;  %v127_v42 = vrot.slane %v126_v37, 4  ;;  %v216_v60 = vsel %vm168_vm5, 1.0, %v255_v59 }
   0xe   :  { %v78_v15 = vrot.slane %v77_v13, 1  ;;  %v217_v61 = vsel %vm169_vm6, 1.0, %v255_v59 }
   0xf   :  { %v85_v16 = vrot.slane %v84_v14, 1  ;;  %v121_v53 = vadd.f32 %v120_v41, %v119_v36  ;;  %v128_v54 = vadd.f32 %v127_v42, %v126_v37  ;;  %v192_v63 = vadd.f32 %v217_v61, %v216_v60 }
  0x10   :  { %v286_v20 = vmax.f32 %v77_v13, %v78_v15 }
  0x11   :  { %v288_v21 = vmax.f32 %v84_v14, %v85_v16  ;;  %v122_v2 = vrot.slane %v121_v53, 2  ;;  %v129_v3 = vrot.slane %v128_v54, 2  ;;  %193 = vadd.xlane.f32.xlu1 %v192_v63  ;;  %v154_v16 = vcvt.s32.f32 %v279_v11 }
  0x12   :  { %v87_v23 = vsub.f32 %v55_v0, %v286_v20  ;;  %vm135_vm3 = vcmp.ge.f32.partialorder %v55_v0, %v286_v20 }
  0x13   :  { %v88_v24 = vsub.f32 %v56_v1, %v288_v21  ;;  %vm136_vm4 = vcmp.ge.f32.partialorder %v56_v1, %v288_v21  ;;  %v138_v29 = vsel %vm135_vm3, %v137_v22, 5.0  ;;  %v123_v10 = vadd.f32 %v122_v2, %v121_v53 }
  0x14   :  { %v89_v27 = vmul.f32 1.442695, %v87_v23  ;;  %v139_v30 = vsel %vm136_vm4, %v137_v22, 5.0  ;;  %v140_v33 = vsel %vm72_vm0, %v138_v29, inf  ;;  %v130_v13 = vadd.f32 %v129_v3, %v128_v54 }
  0x15   :  { %v91_v28 = vmul.f32 1.442695, %v88_v24  ;;  %v147_v34 = vsel %vm72_vm0, %v139_v30, inf  ;;  %v141_v38 = vrot.slane %v140_v33, 4  ;;  %v124_v18 = vrot.slane %v123_v10, 1 }
  0x16   :  { %220 = vpow2.f32 %v89_v27  ;;  %v148_v39 = vrot.slane %v147_v34, 4  ;;  %v131_v19 = vrot.slane %v130_v13, 1  ;;  %v156_v24 = vperm.slane %v154_v16, 0 }
  0x17   :  { %222 = vpow2.f32 %v91_v28  ;;  %v142_v47 = vmin.f32 %v140_v33, %v141_v38  ;;  %v157_v25 = vperm.slane %v154_v16, 1  ;;  %v125_v29 = vadd.f32 %v124_v18, %v123_v10 }
  0x18   :  { %v149_v50 = vmin.f32 %v147_v34, %v148_v39  ;;  %v132_v31 = vadd.f32 %v131_v19, %v130_v13 }
  0x19   :  { %v143_v56 = vrot.slane %v142_v47, 2 }
  0x1a   :  { %v150_v58 = vrot.slane %v149_v50, 2 }
  0x1b   :  { %v144_v5 = vmin.f32 %v142_v47, %v143_v56 }
  0x1c   :  { %v221_v40 = vpop.eup %220  ;;  %v151_v6 = vmin.f32 %v149_v50, %v150_v58 }
  0x1d   :  { %v223_v43 = vpop.eup %222  ;;  %v93_v44 = vsel %vm72_vm0, %v221_v40, 0.0  ;;  %v145_v14 = vrot.slane %v144_v5, 1 }
  0x1e   :  { %v94_v48 = vrot.slane %v93_v44, 4  ;;  %v100_v49 = vsel %vm72_vm0, %v223_v43, 0.0  ;;  %v152_v15 = vrot.slane %v151_v6, 1 }
  0x1f   :  { %v101_v51 = vrot.slane %v100_v49, 4  ;;  %v146_v22 = vmin.f32 %v144_v5, %v145_v14 }
  0x20   :  { %v95_v52 = vadd.f32 %v94_v48, %v93_v44  ;;  %v153_v23 = vmin.f32 %v151_v6, %v152_v15  ;;  %v63_v44 = vand.u32 127, %v62_v12 }
  0x21   :  { %v102_v55 = vadd.f32 %v101_v51, %v100_v49  ;;  %vm160_vm7 = vcmp.eq.f32.partialorder %v146_v22, %v156_v24 }
  0x22   :  { %v96_v57 = vrot.slane %v95_v52, 2  ;;  %vm161_vm8 = vcmp.eq.f32.partialorder %v153_v23, %v157_v25  ;;  %v214_v34 = vsel %vm160_vm7, 1.0, %v255_v59  ;;  %vm195_vm9 = vcmp.eq.s32.totalorder %v63_v44, 0 }
  0x23   :  { %v103_v62 = vrot.slane %v102_v55, 2  ;;  %v215_v35 = vsel %vm161_vm8, 1.0, %v255_v59  ;;  %v181_v39 = vperm.slane %v214_v34, 0  ;;  %vm197_vm10 = vcmp.eq.s32.totalorder %v63_v44, 1 }
  0x24   :  { %v97_v0 = vadd.f32 %v96_v57, %v95_v52  ;;  %v182_v40 = vperm.slane %v215_v35, 0  ;;  %vm200_vm11 = vcmp.eq.s32.totalorder %v63_v44, 2 }
  0x25   :  { %v104_v1 = vadd.f32 %v103_v62, %v102_v55 }
  0x26   :  { %v98_v4 = vrot.slane %v97_v0, 1 }
  0x27   :  { %v105_v7 = vrot.slane %v104_v1, 1 }
  0x28   :  { %v99_v8 = vadd.f32 %v98_v4, %v97_v0 }
  0x29   :  { %v106_v9 = vadd.f32 %v105_v7, %v104_v1 }
  0x2a   :  { %224 = vlog2.f32 %v99_v8 }
  0x2b   :  { %226 = vlog2.f32 %v106_v9 }
  0x30   :  { %v225_v26 = vpop.eup %224 }
  0x31   :  { %v227_v27 = vpop.eup %226  ;;  %v108_v28 = vmul.f32 0.6931472, %v225_v26 }
  0x32   :  { %v110_v30 = vmul.f32 0.6931472, %v227_v27 }
  0x33   :  { %v111_v32 = vadd.f32 %v108_v28, %v286_v20  ;;  %v183_v20 = vsel %vm168_vm5, %v181_v39, 0.0 }
  0x34   :  { %v112_v33 = vadd.f32 %v110_v30, %v288_v21  ;;  %v184_v21 = vsel %vm169_vm6, %v182_v40, 0.0 }
  0x35   :  { %v133_v11 = vsub.f32 %v111_v32, %v125_v29  ;;  %v185_v42 = vadd.f32 %v184_v21, %v183_v20 }
  0x36   :  { %v134_v36 = vsub.f32 %v112_v33, %v132_v31 }
  0x37   :  { %v176_v37 = vsel %vm168_vm5, %v133_v11, 0.0 }
  0x38   :  { %v177_v38 = vsel %vm169_vm6, %v134_v36, 0.0 }
  0x39   :  { %v178_v41 = vadd.f32 %v177_v38, %v176_v37 }
  0x3b   :  { %179 = vadd.xlane.f32.xlu0 %v178_v41 }
  0x43   :  { %186 = vadd.xlane.f32.xlu0 %v185_v42 }
  0x84   :  { %v194_v47 = vpop.xlane.xlu1 %193 }
  0x85   :  { %v201_v51 = vsel %vm200_vm11, %v194_v47, 0.0 }
  0xae   :  { %v180_v43 = vpop.xlane.xlu0 %179 }
  0xaf   :  { %v196_v49 = vsel %vm195_vm9, %v180_v43, 0.0 }
  0xb6   :  { %v187_v48 = vpop.xlane.xlu0 %186 }
  0xb7   :  { %v198_v50 = vsel %vm197_vm10, %v187_v48, 0.0 }
  0xb8   :  { %v199_v52 = vadd.f32 %v198_v50, %v196_v49 }
  0xba   :  { %v202_v45 = vadd.f32 %v201_v51, %v199_v52 }
  0xbc   :  { %205 = vst [vmem:[%s350_s2] sm:$0xff] %v202_v45 }
  0xbd   :  { %210 = vsyncpa [#allocation3], 1 }

</bundles_post_ra>
